<compile_context>
chip_gen: v6e
topology: v6e:2x2x1
jax: 0.10.0
libtpu: 0.0.40
codegen_flags: <defaults>
</compile_context>

<pallas_src>
import functools
import math

import jax
import jax.numpy as jnp
from jax.experimental import pallas as pl
from jax.experimental.pallas import tpu as pltpu


# ----------------------------------------------------------------------------- #
# Parameter setup (the PyTorch register_buffer('pe') construction)
# ----------------------------------------------------------------------------- #
def make_position_encoding_table(max_len: int, d_model: int, dtype=jnp.float32):
    """Sinusoidal table, shape (max_len, d_model); same math as the torch __init__."""
    position = jnp.arange(max_len, dtype=jnp.float32)[:, None]                 # (L, 1)
    div_term = jnp.exp(jnp.arange(0, d_model, 2, dtype=jnp.float32)
                       * (-math.log(10000.0) / d_model))                       # (D/2,)
    angles = position * div_term[None, :]                                      # (L, D/2)
    pe = jnp.zeros((max_len, d_model), dtype=jnp.float32)
    pe = pe.at[:, 0::2].set(jnp.sin(angles))
    pe = pe.at[:, 1::2].set(jnp.cos(angles))
    return pe.astype(dtype)


# ----------------------------------------------------------------------------- #
# Kernel
# ----------------------------------------------------------------------------- #
def _fmix32(h):
    """murmur3 finalizer; works on uint32 scalars or arrays."""
    h = h ^ (h >> 16)
    h = h * jnp.uint32(0x85EBCA6B)
    h = h ^ (h >> 13)
    h = h * jnp.uint32(0xC2B2AE35)
    h = h ^ (h >> 16)
    return h


def _pe_kernel(seed_ref, x_ref, pe_ref, o_ref, *, train: bool, rate: float,
               use_hw_prng: bool):
    # x_ref / o_ref: (TR, TF) VMEM tile (batch dim squeezed out by the BlockSpec)
    # pe_ref:        (TR, TF) VMEM tile (identical layout -> plain tile add)
    y = x_ref[...] + pe_ref[...]

    if train and rate > 0.0:
        # Inverted dropout (nn.Dropout training semantics):
        #   keep iff bits >= rate * 2^32  (integer threshold: no f32 uniform
        #   construction -> fewer VALU ops per element).
        # TODO(synk): matches torch dropout statistics/semantics, not its exact
        # Philox RNG stream (no Pallas equivalent of torch's RNG).
        thresh = min(int(rate * 4294967296.0), 4294967295)
        if use_hw_prng:
            # Hardware PRNG: one vreg of raw bits per element, off the VALU
            # hash path -> kernel stays HBM-bound even for bf16 on v6e/v7x.
            pltpu.prng_seed(seed_ref[0], pl.program_id(0), pl.program_id(1))
            bits = pltpu.prng_random_bits(y.shape)
            if bits.dtype != jnp.uint32:
                bits = pltpu.bitcast(bits, jnp.uint32)
        else:
            # Portable fallback (interpret mode / non-TPU backends):
            # stateless murmur3-fmix counter hash.  Seed and tile index are
            # pre-mixed so nearby seeds / tiles give decorrelated masks, and all
            # arithmetic is u32 (no int32 overflow for huge tensors).
            tr, tf = y.shape
            tile = (pl.program_id(0) * pl.num_programs(1)
                    + pl.program_id(1)).astype(jnp.uint32)
            base = _fmix32(seed_ref[0].astype(jnp.uint32)
                           ^ _fmix32(tile + jnp.uint32(0x9E3779B9)))
            rows = jax.lax.broadcasted_iota(jnp.uint32, y.shape, 0)
            cols = jax.lax.broadcasted_iota(jnp.uint32, y.shape, 1)
            bits = _fmix32(rows * jnp.uint32(tf) + cols + base)

        keep = bits >= jnp.uint32(thresh)
        scale = 1.0 / (1.0 - rate)           # weak-typed -> stays in y's dtype
        y = jnp.where(keep, y * scale, jnp.zeros_like(y))

    o_ref[...] = y.astype(o_ref.dtype)


# ----------------------------------------------------------------------------- #
# Tiling heuristics
# ----------------------------------------------------------------------------- #
def _round_up(n: int, m: int) -> int:
    return ((n + m - 1) // m) * m


def _divisors_leq(n: int, limit: int):
    out, d = [], 1
    while d * d <= n:
        if n % d == 0:
            for c in (d, n // d):
                if c <= limit:
                    out.append(c)
        d += 1
    return out


def _sublane_granularity(itemsize: int) -> int:
    # Native packed-sublane tile: 8 rows (f32), 16 (bf16/f16), 32 (int8/fp8).
    return max(8, 32 // max(1, itemsize))


def _pick_layout(S: int, D: int, itemsize: int, block_lanes: int, block_bytes: int):
    """Pick a lane-dense (num_f, TF) view of the flattened S*D plane + row tile TR.

    Returns (num_f, TF, TR) with num_f * TF >= S * D (pad in the wrapper if >).
    Guarantees: TF is a multiple of 128 (unmasked stores) and TR is either the
    full row dim or a multiple of the dtype's sublane granularity (legal blocks).
    """
    F = S * D
    sub = _sublane_granularity(itemsize)
    lanes_cap = max(128, (block_lanes // 128) * 128)

    if F % 128 == 0:
        # Largest multiple of 128 that divides F and fits the lane budget.
        tf = 128
        c = 256
        while c <= min(lanes_cap, F):
            if F % c == 0:
                tf = c
            c += 128
    else:
        # Pad the flattened plane up to a 128-multiple lane width.
        tf = min(lanes_cap, _round_up(F, 128))

    num_f_raw = -(-F // tf)                                   # cdiv
    max_rows = max(sub, (block_bytes // (tf * itemsize)) // sub * sub)

    if num_f_raw <= max_rows:
        tr = num_f_raw                      # full second-to-last dim -> legal
        num_f = num_f_raw
    else:
        divs = [d for d in _divisors_leq(num_f_raw, max_rows) if d % sub == 0]
        if divs:
            tr = max(divs)
            num_f = num_f_raw
        else:
            tr = max_rows                   # multiple of sub (>= 8) -> legal
            num_f = _round_up(num_f_raw, tr)     # pad so the grid tiles evenly
    return num_f, tf, tr


# ----------------------------------------------------------------------------- #
# Wrapper (the module forward)
# ----------------------------------------------------------------------------- #
def position_encoding(x, pe_table, *, rate: float = 0.1, train: bool = False,
                      seed: int = 0, force_pallas: bool = False,
                      block_lanes: int = 1024, block_bytes: int = 1 << 20,
                      vmem_limit_bytes=None, use_hw_prng=None):
    """out = dropout(x + pe[:S]);  x: (B, S, D), pe_table: (max_len, D)."""
    B, S, D = x.shape
    if S > pe_table.shape[0]:
        raise ValueError(f"sequence length {S} exceeds pe_table max_len {pe_table.shape[0]}")
    if not (0.0 <= rate < 1.0):
        raise ValueError("dropout rate must be in [0, 1)")

    pe = pe_table[:S, :].astype(x.dtype)        # add in model dtype (bf16-friendly)
    do_dropout = bool(train) and rate > 0.0

    # Eval mode is a pure broadcast add that XLA already fuses at HBM roofline;
    # a Pallas launch there is fixed overhead. force_pallas=True overrides (tests).
    if not force_pallas and not do_dropout:
        return x + pe[None, :, :]

    if use_hw_prng is None:
        use_hw_prng = jax.devices()[0].platform == "tpu"

    F = S * D
    num_f, tf, tr = _pick_layout(S, D, x.dtype.itemsize, block_lanes, block_bytes)
    f_pad = num_f * tf

    # Lane-dense views: x -> (B, num_f, TF), pe -> (num_f, TF); pad when F is
    # not a multiple of the chosen layout (keeps unmasked 128-lane stores).
    x2 = x.reshape(B, F)
    pe1 = pe.reshape(F)
    if f_pad != F:
        x2 = jnp.pad(x2, ((0, 0), (0, f_pad - F)))
        pe1 = jnp.pad(pe1, ((0, f_pad - F),))
    x3 = x2.reshape(B, num_f, tf)
    pe2 = pe1.reshape(num_f, tf)
    num_r = num_f // tr

    seed_arr = jnp.array([seed], dtype=jnp.int32)
    kernel = functools.partial(_pe_kernel, train=do_dropout, rate=float(rate),
                               use_hw_prng=bool(use_hw_prng))

    cp_kwargs = dict(dimension_semantics=("parallel", "arbitrary"))
    if vmem_limit_bytes is not None:
        cp_kwargs["vmem_limit_bytes"] = int(vmem_limit_bytes)

    out3 = pl.pallas_call(
        kernel,
        out_shape=jax.ShapeDtypeStruct((B, num_f, tf), x.dtype),
        grid_spec=pltpu.PrefetchScalarGridSpec(
            num_scalar_prefetch=1,                  # dropout seed lives in SMEM
            grid=(num_r, B),                        # row-chunk OUTER, batch INNER
            in_specs=[
                # x: one batch row-chunk per step; batch dim squeezed -> (TR, TF)
                pl.BlockSpec((None, tr, tf), lambda r, b, seed: (b, r, 0)),
                # pe: depends only on the OUTER axis -> resident across batch loop
                pl.BlockSpec((tr, tf), lambda r, b, seed: (r, 0)),
            ],
            out_specs=pl.BlockSpec((None, tr, tf), lambda r, b, seed: (b, r, 0)),
        ),
        compiler_params=pltpu.CompilerParams(**cp_kwargs),
    )(seed_arr, x3, pe2)

    out = out3.reshape(B, f_pad)
    if f_pad != F:
        out = out[:, :F]
    return out.reshape(B, S, D)


# ----------------------------------------------------------------------------- #
# Test harness
# ----------------------------------------------------------------------------- #
if __name__ == "__main__":
    max_len = 2000
    p = 0.1

    # --- Shape implied by the module: batch=2, seq=8, hidden=32 (f32, eval) ----
    B, S, D = 2, 8, 32
    x = jax.random.normal(jax.random.PRNGKey(0), (B, S, D), dtype=jnp.float32)
    pe_table = make_position_encoding_table(max_len, D)
    ref = x + pe_table[None, :S, :]

    out = jax.block_until_ready(
        position_encoding(x, pe_table, rate=p, train=False, force_pallas=True))
    assert out.shape == (B, S, D)
    assert jnp.allclose(out, ref, atol=1e-6, rtol=1e-6)

    # Auto-dispatch path (eval mode -> fused XLA add) agrees.
    out_auto = jax.block_until_ready(position_encoding(x, pe_table, rate=p, train=False))
    assert jnp.allclose(out_auto, ref, atol=1e-6, rtol=1e-6)

    # --- Larger shape + tiny tile budget: multi-tile grid + HW-PRNG dropout ----
    B2, S2, D2 = 2, 64, 64
    x2 = jax.random.normal(jax.random.PRNGKey(1), (B2, S2, D2), dtype=jnp.float32)
    pe_table2 = make_position_encoding_table(max_len, D2)
    ref2 = x2 + pe_table2[None, :S2, :]

    out2 = jax.block_until_ready(
        position_encoding(x2, pe_table2, rate=p, train=False, force_pallas=True,
                          block_lanes=128, block_bytes=8192))
    assert jnp.allclose(out2, ref2, atol=1e-6, rtol=1e-6)

    out_t = jax.block_until_ready(
        position_encoding(x2, pe_table2, rate=p, train=True, seed=123,
                          force_pallas=True, block_lanes=128, block_bytes=8192))
    kept = out_t != 0
    # Kept elements are scaled by 1/(1-p); dropped elements are exactly zero.
    assert jnp.allclose(jnp.where(kept, out_t, 0.0),
                        jnp.where(kept, ref2 / (1.0 - p), 0.0),
                        atol=1e-5, rtol=1e-5)
    drop_frac = float(1.0 - jnp.mean(kept.astype(jnp.float32)))
    assert 0.02 < drop_frac < 0.25, drop_frac

    # --- F % 128 != 0: exercises the lane-padding path (no masked stores) ------
    B3, S3, D3 = 1, 5, 24
    x3 = jax.random.normal(jax.random.PRNGKey(2), (B3, S3, D3), dtype=jnp.float32)
    pe_table3 = make_position_encoding_table(max_len, D3)
    ref3 = x3 + pe_table3[None, :S3, :]
    out3 = jax.block_until_ready(
        position_encoding(x3, pe_table3, rate=p, train=False, force_pallas=True))
    assert jnp.allclose(out3, ref3, atol=1e-6, rtol=1e-6)

    # --- bf16: exercises the dtype-aware sublane tile selection ----------------
    xb = x2.astype(jnp.bfloat16)
    refb = xb + pe_table2[None, :S2, :].astype(jnp.bfloat16)
    outb = jax.block_until_ready(
        position_encoding(xb, pe_table2, rate=p, train=False, force_pallas=True))
    assert outb.dtype == jnp.bfloat16
    assert jnp.allclose(outb.astype(jnp.float32), refb.astype(jnp.float32),
                        atol=1e-2, rtol=1e-2)

    print("KERNEL_OK")
</pallas_src>

<mosaic_0001>
module attributes {stable_mosaic.version = 11 : i64} {
  func.func @_pe_kernel(%arg0: i32, %arg1: i32, %arg2: memref<1xi32, #tpu.memory_space<smem>>, %arg3: memref<1x1x256xf32, #tpu.memory_space<vmem>>, %arg4: memref<1x256xf32, #tpu.memory_space<vmem>>, %arg5: memref<1x1x256xf32, #tpu.memory_space<vmem>>) attributes {dimension_semantics = [#tpu.dimension_semantics<parallel>, #tpu.dimension_semantics<arbitrary>], iteration_bounds = array<i64: 1, 2>, scalar_prefetch = 1 : i64, scratch_operands = 0 : i64, tpu.core_type = #tpu.core_type<tc>, window_params = [{transform_indices = @transform_0, window_bounds = array<i64: 1, 1, 256>}, {transform_indices = @transform_1, window_bounds = array<i64: 1, 256>}, {transform_indices = @transform_2, window_bounds = array<i64: 1, 1, 256>}]} {
    %c0 = arith.constant 0 : index
    %c0_0 = arith.constant 0 : index
    %c0_1 = arith.constant 0 : index
    %0 = vector.load %arg3[%c0, %c0_0, %c0_1] : memref<1x1x256xf32, #tpu.memory_space<vmem>>, vector<1x1x256xf32>
    %1 = vector.shape_cast %0 : vector<1x1x256xf32> to vector<1x256xf32>
    %c0_2 = arith.constant 0 : index
    %c0_3 = arith.constant 0 : index
    %2 = vector.load %arg4[%c0_2, %c0_3] : memref<1x256xf32, #tpu.memory_space<vmem>>, vector<1x256xf32>
    %3 = arith.addf %1, %2 : vector<1x256xf32>
    %c0_4 = arith.constant 0 : index
    %c0_5 = arith.constant 0 : index
    %c0_6 = arith.constant 0 : index
    %4 = vector.load %arg5[%c0_4, %c0_5, %c0_6] : memref<1x1x256xf32, #tpu.memory_space<vmem>>, vector<1x1x256xf32>
    %5 = vector.shape_cast %4 : vector<1x1x256xf32> to vector<1x256xf32>
    %6 = vector.shape_cast %3 : vector<1x256xf32> to vector<1x1x256xf32>
    tpu.vector_store %arg5[%c0_4, %c0_5, %c0_6], %6 {strides = array<i32>} : memref<1x1x256xf32, #tpu.memory_space<vmem>>, vector<1x1x256xf32>,
    return
  }
  func.func @transform_0(%arg0: i32, %arg1: i32, %arg2: memref<1xi32, #tpu.memory_space<smem>>) -> (i32, i32, i32) {
    %c0_i32 = arith.constant 0 : i32
    %c0_i32_0 = arith.constant 0 : i32
    return %arg1, %arg0, %c0_i32 : i32, i32, i32
  }
  func.func @transform_1(%arg0: i32, %arg1: i32, %arg2: memref<1xi32, #tpu.memory_space<smem>>) -> (i32, i32) {
    %c0_i32 = arith.constant 0 : i32
    %c0_i32_0 = arith.constant 0 : i32
    return %arg0, %c0_i32 : i32, i32
  }
  func.func @transform_2(%arg0: i32, %arg1: i32, %arg2: memref<1xi32, #tpu.memory_space<smem>>) -> (i32, i32, i32) {
    %c0_i32 = arith.constant 0 : i32
    %c0_i32_0 = arith.constant 0 : i32
    return %arg1, %arg0, %c0_i32 : i32, i32, i32
  }
}

</mosaic_0001>

<bundles_post_ra>
// kernel: tpu_custom_call.1
= control target key start
LH: loop header
LB: loop body
LE: loop exit
PB: predicated region body
PF: predicated region fallthrough
CT: control target
= control target key end

     0   :  { %9 = vsyncpa [#allocation5], 0  ;;  %s670_s0 = inlined_call_operand.<no memory space> [shape: s32[1], index: 0, kind: input, shape index: {}]   ;;  %s671_s1 = inlined_call_operand.hbm [shape: f32[2,1,256], index: 1, kind: input, shape index: {}]   ;;  %s672_s2 = inlined_call_operand.vmem [shape: f32[1,256], index: 2, kind: input, shape index: {}]   ;;  %s673_s3 = inlined_call_operand.hbm [shape: f32[2,1,256], index: 3, kind: output, shape index: {}]  }
   0x1   :  { %11 = vsyncpa [#allocation5 + $0x1], 0 }
   0x2   :  { %12 = vsyncpa [#allocation6], 0 }
   0x3   :  { %14 = vsyncpa [#allocation6 + $0x1], 0  ;;  %s533_s12 = smov 0   ;;  %s535_s13 = smov 0  }
   0x4   :  { %s537_s14 = smov 0   ;;  %s539_s0 = smov 0  }
   0x5   :  { %s541_s15 = smov 0   ;;  %s543_s16 = smov 0  }
   0x6 LB: > { %s321_s17 = sadd.s32 4294967295, %s509_s16   ;;  %s322_s18 = sadd.s32 4294967294, %s509_s16   ;;  %s509_s16 = sphi %s543_s16, %s20_s16   ;;  %s505_s15 = sphi %s541_s15, %s685_s15   ;;  %s501_s0 = sphi %s539_s0, %s684_s0   ;;  %s497_s14 = sphi %s537_s14, %s683_s14   ;;  %s493_s13 = sphi %s535_s13, %s682_s13   ;;  %s489_s12 = sphi %s533_s12, %s681_s12  }
   0x7   : > { %s29_s19 = sadd.s32 1, %s505_s15  ;;  %s41_s20 = sadd.s32 1, %s497_s14 }
   0x8   : > { %p30_p0 = scmp.ge.s32.totalorder %s29_s19, 2  ;;  %p48_p1 = scmp.ne.s32.totalorder %s497_s14, %s493_s13 }
   0x9   : > { %p49_p2 = scmp.eq.s32.totalorder %s509_s16, 0  ;;  %p54_p3 = scmp.ne.s32.totalorder %s493_s13, %s489_s12 }
   0xa   : > { %s687_s19 = smov (%p30_p0, %s29_s19), 0  ;;  %p55_p5 = scmp.eq.s32.totalorder %s321_s17, 0 }
   0xb   : > { %p574_p4 = por %p49_p2, %p48_p1  ;;  %s36_s22 = ssub.s32 %s505_s15, %s687_s19 }
   0xc   : > { %p106_p6 = scmp.eq.s32.totalorder %s321_s17, 1  ;;  %p39_p7 = scmp.eq.s32.totalorder %s36_s22, 0 }
   0xd   : > { %p580_p8 = por %p55_p5, %p54_p3  ;;  %p112_p10 = scmp.eq.s32.totalorder %s322_s18, 1 }
   0xe   : > { %p584_p9 = por %p106_p6, %p48_p1  ;;  %p351_p13 = scmp.lt.s32.totalorder %s509_s16, 2 }
   0xf   : > { %s589_s25 = scalar_select %p39_p7, %s497_s14, %s41_s20  }
  0x10   : > { %p591_p11 = por %p112_p10, %p54_p3  ;;  %s139_s27 = sand.u32 1, %s497_s14  }
  0x11   : > { %s326_s28 = sshll.u32 %s139_s27, 1  ;;  %s337_s29 = sshll.u32 %s505_s15, 5 }
  0x12   : > { %s677_s26 = scalar_select %p591_p11, 1, 0 }
  0x13   : > { %s151_s5 = scalar_lea.hbm %s671_s1, %s337_s29  ;;  %s143_s6 = scalar_lea.vmem [#allocation4], %s326_s28 }
  0x14   : > { %s153_s7 = sshll.u32 %s143_s6, 4  ;;  %p604_p0 = pnand %p351_p13, %p574_p4  ;;  %s154_s7 = int_to_ptr.vmem [resolvable:$true] %s153_s7 }
  0x15   : > { %p329_p1 = scmp.ge.s32.totalorder %s509_s16, 1  ;;  %p158_p2 = scmp.lt.s32.totalorder %s509_s16, 3 }
  0x16   : > { %s140_s9 = scalar_lea.sflag [#allocation5], %s139_s27  ;;  %p403_p3 = pneg %p604_p0 }
  0x17   : > { %s414_s10 = scalar_lea.vmem %s154_s7, 32  ;;  %s511_s11 = smov [#allocation4]  }
  0x18   : > { %p415_p5 = scmp.ne.s32.totalorder %s154_s7, %s414_s10  ;;  %s419_s17 = sshll.u32 %s511_s11, 4  ;;  %s420_s17 = int_to_ptr.vmem [resolvable:$false] %s419_s17 }
  0x19   : > { %s421_s18 = scalar_lea.vmem %s420_s17, 64  ;;  %p422_p10 = scmp.lt.s32.totalorder %s154_s7, %s420_s17 }
  0x1a   : > { %p417_p6 = pnand %p415_p5, %p403_p3  ;;  %p423_p12 = scmp.lt.s32.totalorder %s421_s18, %s414_s10 }
  0x1c   : > { %p418_p7 = pneg %p417_p6  ;;  %p424_p4 = por %p423_p12, %p422_p10 }
  0x1e   : > { %p425_p13 = pnand %p424_p4, %p418_p7 }
  0x20   : > { %428 = shalt.err (!%p425_p13)
}
  0x21   : > { %346 = dma.hbm_to_vmem [thread:$0]  (!%p604_p0), %s151_s5, 32, %s154_s7, %s140_s9  }
  0x22   : > { %p159_p11 = pnand %p329_p1, %p158_p2 }
  0x23   : > { %s619_s20 = sand.u32 (!%p159_p11), 1, %s493_s13  }
  0x24   : > { %162 = sbr.rel (%p159_p11) target bundleno = 66 (0x42), region = 28  ;;  %s330_s21 = sshll.u32 (!%p159_p11), %s619_s20, 1 }
  0x25   : > { %s165_s22 = scalar_lea.sflag (!%p159_p11), [#allocation5], %s619_s20  ;;  %s168_s27 = scalar_lea.vmem (!%p159_p11), [#allocation4], %s330_s21 }
  0x29   : > { %480 = dma.done.wait (%p580_p8), %s165_s22, 32  }
  0x2a   : > { %482 = vsyncadd (%p580_p8), %s165_s22, 4294967264  ;;  %v200_v0 = vlaneseq  ;;  %s192_s28 = scalar_lea.vmem [#allocation7], %s330_s21  ;;  %s338_s30 = sshll.u32 %s501_s0, 5  ;;  %v197_v1 = vld [vmem:[%s168_s27] sm:$0x3] }
  0x2b   : > { %s222_s29 = sshll.u32 %s192_s28, 4  ;;  %v198_v2 = vld [vmem:[%s672_s2] sm:$0x3]  ;;  %s220_s23 = scalar_lea.hbm %s673_s3, %s338_s30  ;;  %s223_s29 = int_to_ptr.vmem [resolvable:$true] %s222_s29 }
  0x2c   : > { %vm202_vm0 = vcmp.lt.s32.totalorder %v200_v0, 256  ;;  %v199_v3 = vadd.f32 %v198_v2, %v197_v1  ;;  %s206_s8 = scalar_lea.sflag [#allocation6], %s619_s20  ;;  %s429_s9 = scalar_lea.vmem %s223_s29, 32 }
  0x2d   : > { %p430_p8 = scmp.ne.s32.totalorder %s223_s29, %s429_s9  ;;  %s512_s0 = smov [#allocation7]  }
  0x2e   : > { %204 = vst.msk [vmem:[%s192_s28] sm:$0x3] %vm202_vm0, %v199_v3  ;;  %s433_s10 = sshll.u32 %s512_s0, 4  ;;  %s434_s10 = int_to_ptr.vmem [resolvable:$false] %s433_s10 }
  0x2f   : > { %p431_p11 = pnand %p430_p8, %p584_p9  ;;  %s435_s11 = scalar_lea.vmem %s434_s10, 64 }
  0x30   : > { %p436_p0 = scmp.lt.s32.totalorder %s223_s29, %s434_s10  ;;  %p437_p1 = scmp.lt.s32.totalorder %s435_s11, %s429_s9 }
  0x31   : > { %p432_p12 = pneg %p431_p11 }
  0x32   : > { %p438_p2 = por %p437_p1, %p436_p0 }
  0x34   : > { %p439_p3 = pnand %p438_p2, %p432_p12 }
  0x36   : > { %442 = shalt.err (!%p439_p3)
}
  0x37   : > { %s443_s17 = scalar_lea.hbm %s220_s23, 32  ;;  %s447_s21 = scalar_lea.hbm %s673_s3, 64 }
  0x38   : > { %p444_p5 = scmp.ne.s32.totalorder %s220_s23, %s443_s17  ;;  %p448_p10 = scmp.lt.s32.totalorder %s220_s23, %s673_s3 }
  0x39   : > { %p449_p4 = scmp.lt.s32.totalorder %s447_s21, %s443_s17 }
  0x3a   : > { %p445_p6 = pnand %p444_p5, %p584_p9 }
  0x3b   : > { %p450_p13 = por %p449_p4, %p448_p10 }
  0x3c   : > { %p446_p7 = pneg %p445_p6 }
  0x3e   : > { %p451_p8 = pnand %p450_p13, %p446_p7 }
  0x40   : > { %454 = shalt.err (!%p451_p8)
}
  0x41   : > { %341 = dma.vmem_to_hbm [thread:$0]  (%p584_p9), %s223_s29, 32, %s220_s23, %s206_s8  }
  0x42 PF: > { %s234_s28 = sand.u32 1, %s489_s12   ;;  %p679_p11 = scmp.ne.s32.totalorder %s677_s26, 0 }
  0x43   : > { %p680_p12 = scmp.ge.s32.totalorder %s509_s16, 2  ;;  %s235_s30 = scalar_lea.sflag [#allocation6], %s234_s28 }
  0x45   : > { %p348_p0 = pnand %p680_p12, %p679_p11 }
  0x47   : > { %p349_p1 = pneg %p348_p0 }
  0x49   : > { %484 = dma.done.wait (%p349_p1), %s235_s30, 32  }
  0x4a   : > { %486 = vsyncadd (%p349_p1), %s235_s30, 4294967264  ;;  %s20_s16 = sadd.s32 1, %s509_s16   ;;  %s681_s12 = smov %s493_s13 }
  0x4b   : > { %p17_p2 = scmp.ge.s32.totalorder %s20_s16, 4   ;;  %s682_s13 = smov %s497_s14 }
  0x4c   : > { %s683_s14 = smov %s589_s25  ;;  %s684_s0 = smov %s505_s15 }
  0x4d   : > { %s685_s15 = smov %s687_s19  ;;  %19 = sbr.rel (!%p17_p2) target bundleno = 6 (0x6), region = 76 }
  0x52   :  { %240 = vsyncpa [#allocation5], 1 }
  0x53   :  { %242 = vsyncpa [#allocation5 + $0x1], 1 }
  0x54   :  { %243 = vsyncpa [#allocation6], 1 }
  0x55   :  { %245 = vsyncpa [#allocation6 + $0x1], 1 }

</bundles_post_ra>
